<compile_context>
chip_gen: v5e
topology: v5e:2x2
jax: 0.10.0
libtpu: 0.0.40
codegen_flags: <defaults>
</compile_context>

<pallas_src>
import math

import jax
import jax.numpy as jnp
from jax.experimental import pallas as pl
from jax.experimental.pallas import tpu as pltpu


def make_positional_encoding(d_model: int, max_len: int = 5000,
                             dtype=jnp.float32) -> jax.Array:
    """Deterministic parameter setup (mirrors PyTorch __init__). Plain-JAX glue."""
    position = jnp.arange(max_len, dtype=jnp.float32)[:, None]          # (max_len, 1)
    div_term = jnp.exp(jnp.arange(0, d_model, 2, dtype=jnp.float32)
                       * (-math.log(10000.0) / d_model))                # (d_model/2,)
    pe = jnp.zeros((max_len, 1, d_model), dtype=jnp.float32)
    pe = pe.at[:, 0, 0::2].set(jnp.sin(position * div_term))
    pe = pe.at[:, 0, 1::2].set(jnp.cos(position * div_term))
    return pe.astype(dtype)


def _pick_seq_block(S: int, bytes_per_seq_row: int, budget_bytes: int) -> int:
    """Largest divisor ts of S with ts % 8 == 0 (or ts == S, so the pe block
    stays (8,128)-legal) whose double-buffered working set fits the budget."""
    valid = [d for d in range(1, S + 1) if S % d == 0 and (d % 8 == 0 or d == S)]
    fitting = [d for d in valid if 2 * d * bytes_per_seq_row <= budget_bytes]
    return max(fitting) if fitting else min(valid)


def positional_encoding_forward(x: jax.Array,
                                pe: jax.Array,
                                *,
                                p: float = 0.1,
                                training: bool = True,
                                key: jax.Array | None = None,
                                block_seq: int | None = None) -> jax.Array:
    """y = dropout(x + pe[:S], p) with x: [S, B, D], pe: [max_len, 1, D]."""
    S, B, D = x.shape
    assert pe.shape[0] >= S and pe.shape[1] == 1 and pe.shape[2] == D

    # pe in x.dtype (bf16 activations => half the pe HBM read); the add then
    # intentionally runs in x.dtype.
    pe_s = pe[:S, 0, :].astype(x.dtype)          # (S, D) — dense 2D, no size-1 sublane dim
    # Free row-major reshape [S, B, D] -> [S*B, D]: lanes = D, sublanes = S*B,
    # so every block / DMA / store is lane- and sublane-dense.
    x2d = x.reshape(S * B, D)

    apply_dropout = bool(training) and p > 0.0
    itemsize = jnp.dtype(x.dtype).itemsize
    # Bytes streamed per sequence row: x + out (+ uint32 bits) + pe.
    bytes_per_seq_row = B * D * (2 * itemsize + (4 if apply_dropout else 0)) + D * itemsize

    if block_seq is None:
        # ~12 MiB double-buffered working set: fits v5e's 16 MiB default scoped
        # VMEM and leaves plenty of headroom on v6e/v7x (32 MiB default),
        # while still being large enough (hundreds of seq rows for typical D)
        # to approach the HBM roofline.
        ts = _pick_seq_block(S, bytes_per_seq_row, budget_bytes=6 * 2**20)
    else:
        ts = block_seq
        assert S % ts == 0 and (ts % 8 == 0 or ts == S)
    rows = ts * B
    grid = (S // ts,)

    inv_keep = 1.0 / (1.0 - p) if apply_dropout else 1.0
    # keep element iff u32 >= floor(p * 2^32)  =>  P[keep] = 1 - p
    # (flooring biases keep-prob by < 2^-32 — negligible).
    thr = min(int(p * (2 ** 32)), 2 ** 32 - 1) if apply_dropout else 0

    def add_pe(x_blk, pe_blk):
        # Broadcast the (ts, D) positional block over the batch rows of the
        # flattened (ts*B, D) x block.  (Optional further win: generate pe on
        # the fly in-kernel for small B; kept streamed here for robustness.)
        if B == 1:
            return x_blk + pe_blk
        y = x_blk.reshape(ts, B, D) + pe_blk[:, None, :]
        return y.reshape(rows, D)

    if apply_dropout:
        if key is None:
            key = jax.random.PRNGKey(0)
        # TODO(synk): PyTorch's dropout RNG stream cannot be bit-matched; mask
        # statistics and 1/(1-p) scaling follow nn.Dropout semantics.  Bits are
        # produced by jax.random in the wrapper (portable — the TPU hardware
        # PRNG has no interpret/CPU lowering) and streamed into the kernel.
        bits = jax.random.bits(key, (S * B, D), dtype=jnp.uint32)

        def kernel(x_ref, pe_ref, bits_ref, o_ref):
            y = add_pe(x_ref[...], pe_ref[...])
            keep = bits_ref[...] >= jnp.uint32(thr)
            y = jnp.where(keep, y * inv_keep, 0)
            o_ref[...] = y.astype(o_ref.dtype)

        in_specs = [
            pl.BlockSpec((rows, D), lambda i: (i, 0)),
            pl.BlockSpec((ts, D), lambda i: (i, 0)),
            pl.BlockSpec((rows, D), lambda i: (i, 0)),
        ]
        args = (x2d, pe_s, bits)
    else:
        def kernel(x_ref, pe_ref, o_ref):
            o_ref[...] = add_pe(x_ref[...], pe_ref[...]).astype(o_ref.dtype)

        in_specs = [
            pl.BlockSpec((rows, D), lambda i: (i, 0)),
            pl.BlockSpec((ts, D), lambda i: (i, 0)),
        ]
        args = (x2d, pe_s)

    out2d = pl.pallas_call(
        kernel,
        out_shape=jax.ShapeDtypeStruct((S * B, D), x.dtype),
        grid=grid,
        in_specs=in_specs,
        out_specs=pl.BlockSpec((rows, D), lambda i: (i, 0)),
        compiler_params=pltpu.CompilerParams(
            # Seq blocks are fully independent -> shard across v7x's 2 TCs;
            # neutral on single-TC v5e/v6e.
            dimension_semantics=("parallel",)),
    )(*args)
    return out2d.reshape(S, B, D)


if __name__ == "__main__":
    # Small shapes consistent with the module: [seq_len, batch, d_model]
    S, B, D = 8, 2, 32
    MAX_LEN = 64
    P = 0.1

    key = jax.random.PRNGKey(0)
    x = jax.random.normal(key, (S, B, D), dtype=jnp.float32)
    pe = make_positional_encoding(D, max_len=MAX_LEN, dtype=jnp.float32)
    ref = x + pe[:S]

    # --- eval path (dropout is identity): exact check against x + pe[:S] ---
    y_eval = positional_encoding_forward(x, pe, p=P, training=False)
    y_eval = jax.block_until_ready(y_eval)
    assert y_eval.shape == (S, B, D) and y_eval.dtype == x.dtype
    assert jnp.allclose(y_eval, ref, atol=1e-6), "eval path mismatch"

    # --- training path (dropout active, mask streamed from jax.random) ---
    y_train = positional_encoding_forward(x, pe, p=P, training=True,
                                          key=jax.random.PRNGKey(1))
    y_train = jax.block_until_ready(y_train)
    # Every surviving element equals ref / (1 - p); dropped elements are 0.
    # (Treating exact-zero outputs as "dropped" is a test-only simplification.)
    kept = y_train != 0.0
    assert jnp.allclose(jnp.where(kept, y_train, 0.0),
                        jnp.where(kept, ref / (1.0 - P), 0.0),
                        atol=1e-5), "training path scaling mismatch"

    print("KERNEL_OK")
</pallas_src>

<mosaic_0001>
module attributes {stable_mosaic.version = 11 : i64} {
  func.func @kernel(%arg0: i32, %arg1: memref<16x32xf32, #tpu.memory_space<vmem>>, %arg2: memref<8x32xf32, #tpu.memory_space<vmem>>, %arg3: memref<16x32xf32, #tpu.memory_space<vmem>>) attributes {dimension_semantics = [#tpu.dimension_semantics<parallel>], iteration_bounds = array<i64: 1>, scalar_prefetch = 0 : i64, scratch_operands = 0 : i64, tpu.core_type = #tpu.core_type<tc>, window_params = [{transform_indices = @transform_0, window_bounds = array<i64: 16, 32>}, {transform_indices = @transform_1, window_bounds = array<i64: 8, 32>}, {transform_indices = @transform_2, window_bounds = array<i64: 16, 32>}]} {
    %c0 = arith.constant 0 : index
    %c0_0 = arith.constant 0 : index
    %0 = vector.load %arg1[%c0, %c0_0] : memref<16x32xf32, #tpu.memory_space<vmem>>, vector<16x32xf32>
    %c0_1 = arith.constant 0 : index
    %c0_2 = arith.constant 0 : index
    %1 = vector.load %arg2[%c0_1, %c0_2] : memref<8x32xf32, #tpu.memory_space<vmem>>, vector<8x32xf32>
    %2 = vector.shape_cast %0 : vector<16x32xf32> to vector<8x2x32xf32>
    %3 = vector.shape_cast %1 : vector<8x32xf32> to vector<8x1x32xf32>
    %4 = vector.broadcast %3 : vector<8x1x32xf32> to vector<8x2x32xf32>
    %5 = arith.addf %2, %4 : vector<8x2x32xf32>
    %6 = vector.shape_cast %5 : vector<8x2x32xf32> to vector<16x32xf32>
    %c0_3 = arith.constant 0 : index
    %c0_4 = arith.constant 0 : index
    %7 = vector.load %arg3[%c0_3, %c0_4] : memref<16x32xf32, #tpu.memory_space<vmem>>, vector<16x32xf32>
    tpu.vector_store %arg3[%c0_3, %c0_4], %6 {strides = array<i32>} : memref<16x32xf32, #tpu.memory_space<vmem>>, vector<16x32xf32>,
    return
  }
  func.func @transform_0(%arg0: i32) -> (i32, i32) {
    %c0_i32 = arith.constant 0 : i32
    %c0_i32_0 = arith.constant 0 : i32
    return %arg0, %c0_i32 : i32, i32
  }
  func.func @transform_1(%arg0: i32) -> (i32, i32) {
    %c0_i32 = arith.constant 0 : i32
    %c0_i32_0 = arith.constant 0 : i32
    return %arg0, %c0_i32 : i32, i32
  }
  func.func @transform_2(%arg0: i32) -> (i32, i32) {
    %c0_i32 = arith.constant 0 : i32
    %c0_i32_0 = arith.constant 0 : i32
    return %arg0, %c0_i32 : i32, i32
  }
}

</mosaic_0001>

<bundles_post_ra>
// kernel: tpu_custom_call.1
= control target key start
LH: loop header
LB: loop body
LE: loop exit
PB: predicated region body
PF: predicated region fallthrough
CT: control target
= control target key end

     0   :  { %7 = vsyncpa [#allocation3], 0  ;;  %s259_s0 = inlined_call_operand.hbm [shape: f32[16,32], index: 0, kind: input, shape index: {}]   ;;  %s260_s1 = inlined_call_operand.hbm [shape: f32[8,32], index: 1, kind: input, shape index: {}]   ;;  %s261_s2 = inlined_call_operand.hbm [shape: f32[16,32], index: 2, kind: output, shape index: {}]  }
   0x1   :  { %8 = vsyncpa [#allocation6], 0 }
   0x2   :  { %9 = vsyncpa [#allocation4], 0  ;;  %s14_s11 = sshll.u32 %s259_s0, 4  ;;  %s224_s12 = smov [#allocation2]   ;;  %s15_s11 = int_to_ptr.hbm [resolvable:$true] %s14_s11 }
   0x3   :  { %s16_s13 = sshll.u32 %s224_s12, 4  ;;  %s28_s16 = sshll.u32 %s260_s1, 4  ;;  %s17_s13 = int_to_ptr.vmem [resolvable:$true] %s16_s13  ;;  %s29_s16 = int_to_ptr.hbm [resolvable:$true] %s28_s16 }
   0x4   :  { %s225_s17 = smov 128   ;;  %s226_s18 = smov 8  }
   0x5   :  { %22 = dma.hbm_to_vmem [thread:$0]  %s15_s11, 256, %s17_s13, [#allocation3], %s225_s17, %s225_s17, %s226_s18  }
   0x6   :  { %s227_s19 = smov [#allocation5]  }
   0x7   :  { %s30_s20 = sshll.u32 %s227_s19, 4  ;;  %s31_s20 = int_to_ptr.vmem [resolvable:$true] %s30_s20 }
   0x8   :  { %33 = dma.hbm_to_vmem [thread:$0]  %s29_s16, 128, %s31_s20, [#allocation6]  }
   0x9   :  { %218 = dma.done.wait [#allocation3], 256  }
   0xa   :  { %219 = vsyncadd [#allocation3], 4294967040 }
   0xb   :  { %220 = dma.done.wait [#allocation6], 128  }
   0xc   :  { %221 = vsyncadd [#allocation6], 4294967168  ;;  %v42_v0 = vld [vmem:[#allocation2] sm:$0xff]  ;;  %v44_v1 = vld [vmem:[#allocation5] sm:$0xff]  ;;  %vm118_vm0 = vcmask 261120   ;;  %s228_s0 = smov [#allocation7]  }
   0xd   :  { %v43_v2 = vld [vmem:[#allocation2 + $0x8] sm:$0xff]  ;;  %v67_v3 = vperm.slane %v44_v1, 0  ;;  %v47_v4 = vrot.slane %v42_v0, 2  ;;  %v60_v5 = vrot.slane %v44_v1, 1  ;;  %v48_v6 = vrot.slane %v42_v0, 4  ;;  %s125_s1 = sshll.u32 %s228_s0, 4  ;;  %s126_s1 = int_to_ptr.vmem [resolvable:$true] %s125_s1 }
   0xe   :  { %v61_v7 = vrot.slane %v44_v1, 2  ;;  %v49_v8 = vrot.slane %v42_v0, 6  ;;  %v62_v9 = vrot.slane %v44_v1, 3  ;;  %v63_v10 = vrot.slane %v44_v1, 4  ;;  %s127_s23 = sshll.u32 %s261_s2, 4  ;;  %s128_s23 = int_to_ptr.hbm [resolvable:$true] %s127_s23 }
   0xf   :  { %v83_v11 = vadd.f32 %v67_v3, %v42_v0  ;;  %v68_v12 = vperm.slane %v60_v5, 0  ;;  %v50_v13 = vrot.slane %v43_v2, 2  ;;  %v64_v14 = vrot.slane %v44_v1, 5 }
  0x10   :  { %v69_v15 = vperm.slane %v61_v7, 0  ;;  %v70_v16 = vperm.slane %v62_v9, 0  ;;  %v71_v17 = vperm.slane %v63_v10, 0  ;;  %v51_v18 = vrot.slane %v43_v2, 4 }
  0x11   :  { %99 = vst [vmem:[#allocation1] ss:$4 sm:$0xff] %v83_v11  ;;  %v84_v19 = vadd.f32 %v68_v12, %v47_v4  ;;  %v72_v20 = vperm.slane %v64_v14, 0  ;;  %v65_v21 = vrot.slane %v44_v1, 6  ;;  %v52_v22 = vrot.slane %v43_v2, 6 }
  0x12   :  { %v85_v23 = vadd.f32 %v69_v15, %v48_v6  ;;  %v86_v24 = vadd.f32 %v70_v16, %v49_v8  ;;  %v87_v25 = vadd.f32 %v71_v17, %v43_v2  ;;  %v66_v26 = vrot.slane %v44_v1, 7 }
  0x13   :  { %101 = vst [vmem:[#allocation1 + $0x1] ss:$4 sm:$0xff] %v84_v19  ;;  %v88_v27 = vadd.f32 %v72_v20, %v50_v13  ;;  %v73_v28 = vperm.slane %v65_v21, 0 }
  0x14   :  { %103 = vst [vmem:[#allocation1 + $0x2] ss:$4 sm:$0xff] %v85_v23  ;;  %v74_v29 = vperm.slane %v66_v26, 0 }
  0x15   :  { %105 = vst [vmem:[#allocation1 + $0x3] ss:$4 sm:$0xff] %v86_v24  ;;  %v89_v30 = vadd.f32 %v73_v28, %v51_v18 }
  0x16   :  { %107 = vst [vmem:[#allocation1 + $0x20] ss:$4 sm:$0xff] %v87_v25  ;;  %v90_v31 = vadd.f32 %v74_v29, %v52_v22 }
  0x17   :  { %109 = vst [vmem:[#allocation1 + $0x21] ss:$4 sm:$0xff] %v88_v27 }
  0x18   :  { %111 = vst [vmem:[#allocation1 + $0x22] ss:$4 sm:$0xff] %v89_v30 }
  0x19   :  { %113 = vst [vmem:[#allocation1 + $0x23] ss:$4 sm:$0xff] %v90_v31 }
  0x1c   :  { %v114_v32 = vld.sshfl [vmem:[#allocation1] sm:$0xff pattern:$0x73625140] }
  0x1d   :  { %119 = vst.msk [vmem:[#allocation7] sm:$0xff] %vm118_vm0, %v114_v32 }
  0x20   :  { %v115_v33 = vld.sshfl [vmem:[#allocation1 + $0x20] sm:$0xff pattern:$0x73625140] }
  0x21   :  { %120 = vst.msk [vmem:[#allocation7 + $0x8] sm:$0xff] %vm118_vm0, %v115_v33 }
  0x22   :  { %133 = dma.vmem_to_hbm [thread:$0]  %s126_s1, 256, %s128_s23, [#allocation4], %s225_s17, %s225_s17, %s226_s18  }
  0x23   :  { %222 = dma.done.wait [#allocation4], 256  }
  0x24   :  { %223 = vsyncadd [#allocation4], 4294967040 }
  0x25   :  { %138 = vsyncpa [#allocation3], 1 }
  0x26   :  { %139 = vsyncpa [#allocation6], 1 }
  0x27   :  { %140 = vsyncpa [#allocation4], 1 }

</bundles_post_ra>
